<compile_context>
chip_gen: v7x
topology: tpu7x:2x2x1
jax: 0.10.0
libtpu: 0.0.40
codegen_flags: <defaults>
</compile_context>

<pallas_src>
import functools

import jax
import jax.numpy as jnp
from jax.experimental import pallas as pl
from jax.experimental.pallas import tpu as pltpu


def _round_up(x, m):
    return ((x + m - 1) // m) * m


def _lora_qkv_kernel(x_ref, wqkv_ref, bqkv_ref, a_ref, b_ref, out_ref):
    C = x_ref.shape[1]
    x = x_ref[...]                                            # (tm, C)

    # Base qkv projection + bias, f32 accumulation on the MXU.
    base = jnp.dot(x, wqkv_ref[...], preferred_element_type=jnp.float32)
    base = base + bqkv_ref[...]                               # (tm, 3C) f32

    # Fused LoRA path with compact output width 2C:
    #   mid  = x @ [A_q^T | A_v^T]                (tm, 2r)
    #   lora = mid @ diag(B_q^T, B_v^T)           (tm, 2C)   -- no zero K cols
    mid = jnp.dot(x, a_ref[...], preferred_element_type=jnp.float32)
    lora = jnp.dot(mid.astype(b_ref.dtype), b_ref[...],
                   preferred_element_type=jnp.float32)

    # In-register add of the q / v LoRA halves, then ONE full-width lane-dense
    # (tm, 3C) store.  The value slices are lane-aligned whenever C % 128 == 0.
    out = jnp.concatenate(
        [base[:, :C] + lora[:, :C],               # q
         base[:, C:2 * C],                        # k (untouched)
         base[:, 2 * C:] + lora[:, C:]],          # v
        axis=-1)
    out_ref[...] = out.astype(out_ref.dtype)


def prepare_lora_qkv_weights(w_qkv, b_qkv, a_q, b_q, a_v, b_v, mxu_dtype=None):
    """One-time layout/dtype prep (do at model init, NOT per forward call).

    Inputs follow the PyTorch Linear convention (out_features, in_features):
      w_qkv: (3C, C)   b_qkv: (3C,)
      a_q, a_v: (r, C) b_q, b_v: (C, r)

    mxu_dtype=jnp.bfloat16 is recommended on v5e, v6e AND v7x (all have
    bf16-native MXUs); accumulation and the bias add remain f32 in-kernel.
    """
    C = w_qkv.shape[1]
    r = a_q.shape[0]
    mxu_dtype = mxu_dtype or w_qkv.dtype

    wqkv_t = w_qkv.T.astype(mxu_dtype)                        # (C, 3C)
    bias2d = b_qkv.reshape(1, 3 * C).astype(jnp.float32)      # f32 bias add

    # Fold q/v LoRA into one rank-2r pair of matmuls.
    a_cat = jnp.concatenate([a_q.T, a_v.T], axis=1).astype(mxu_dtype)  # (C, 2r)
    # Compact block-diagonal B (2r, 2C): q half -> cols [0,C), v half -> [C,2C).
    b_cat = jnp.zeros((2 * r, 2 * C), dtype=mxu_dtype)
    b_cat = b_cat.at[:r, :C].set(b_q.T.astype(mxu_dtype))
    b_cat = b_cat.at[r:, C:].set(b_v.T.astype(mxu_dtype))
    return wqkv_t, bias2d, a_cat, b_cat


def _weight_spec(shape, single_buffer):
    """BlockSpec for a grid-invariant operand; single-buffer when supported."""
    index_map = lambda i: (0,) * len(shape)
    if single_buffer:
        try:
            return pl.BlockSpec(shape, index_map, pipeline_mode=pl.Buffered(1))
        except TypeError:           # older BlockSpec signature
            pass
    return pl.BlockSpec(shape, index_map)


@functools.partial(jax.jit,
                   static_argnames=("tm", "out_dtype", "single_buffer_weights"))
def lora_qkv(x, wqkv_t, bias2d, a_cat, b_cat, *, tm=512, out_dtype=None,
             single_buffer_weights=True):
    """x: (B, N, C).  Weights pre-prepared by prepare_lora_qkv_weights().

    tm: row tile.  512 is the v5e/v6e sweet spot; use 256-384 on v7x (64 MiB
    VMEM).  out_dtype=jnp.bfloat16 halves output HBM/vst traffic when the
    consumer tolerates it.
    """
    B, N, C = x.shape
    out_dtype = out_dtype or x.dtype
    M = B * N
    r2 = a_cat.shape[1]                                       # 2r
    w_dtype = wqkv_t.dtype
    w_isz = jnp.dtype(w_dtype).itemsize
    o_isz = jnp.dtype(out_dtype).itemsize

    x2 = x.reshape(M, C).astype(w_dtype)

    # Row-tile selection:
    #  * sublane multiple: 16 for packed MXU dtypes (bf16), 8 for f32
    #  * cap tile so small-M calls still get >=2 grid steps (v7x megacore)
    #  * don't over-pad tiny M
    sm = 8 if w_isz >= 4 else 16
    tm_eff = min(tm, _round_up(pl.cdiv(M, 2), 128))
    tm_eff = min(tm_eff, _round_up(M, sm))
    tm_eff = max(sm, _round_up(tm_eff, sm))
    M_pad = _round_up(M, tm_eff)
    if M_pad != M:
        x2 = jnp.pad(x2, ((0, M_pad - M), (0, 0)))            # padded rows sliced off
    grid = (M_pad // tm_eff,)

    # TODO(synk): for C >= 1536 with f32 weights on v7x, add a second grid axis
    # over the 3C output dim so W_qkv^T streams in N-tiles instead of staying
    # fully resident (it does not fit 64 MiB VMEM in that regime).

    # Tight, computed VMEM budget (weights x1 when single-buffered, x/out tiles
    # double-buffered, f32 in-kernel temporaries, Mosaic scratch headroom).
    n_wbuf = 1 if single_buffer_weights else 2
    vmem_bytes = (
        n_wbuf * (C * 3 * C + C * r2 + r2 * 2 * C) * w_isz    # resident weights
        + n_wbuf * 3 * C * 4                                  # f32 bias
        + 2 * tm_eff * C * w_isz                              # x tile (double-buffered)
        + 2 * tm_eff * 3 * C * o_isz                          # out tile (double-buffered)
        + 3 * tm_eff * 3 * C * 4                              # f32 temporaries
        + (4 << 20))                                          # scratch headroom
    vmem_limit = int(min(max(vmem_bytes, 8 << 20), 100 << 20))

    flops = (2 * M_pad * C * 3 * C                            # base qkv
             + 2 * M_pad * C * r2                             # x @ A_cat
             + 2 * M_pad * r2 * 2 * C)                        # mid @ B_cat
    bytes_accessed = int(x2.size * w_isz
                         + wqkv_t.size * w_isz
                         + bias2d.size * 4
                         + a_cat.size * w_isz
                         + b_cat.size * w_isz
                         + M_pad * 3 * C * o_isz)

    out = pl.pallas_call(
        _lora_qkv_kernel,
        out_shape=jax.ShapeDtypeStruct((M_pad, 3 * C), out_dtype),
        grid_spec=pltpu.PrefetchScalarGridSpec(
            num_scalar_prefetch=0,
            grid=grid,
            in_specs=[
                pl.BlockSpec((tm_eff, C), lambda i: (i, 0)),              # x rows
                _weight_spec((C, 3 * C), single_buffer_weights),          # W_qkv^T
                _weight_spec((1, 3 * C), single_buffer_weights),          # bias (f32)
                _weight_spec((C, r2), single_buffer_weights),             # [A_q^T|A_v^T]
                _weight_spec((r2, 2 * C), single_buffer_weights),         # diag(B_q^T,B_v^T)
            ],
            out_specs=pl.BlockSpec((tm_eff, 3 * C), lambda i: (i, 0)),
        ),
        compiler_params=pltpu.CompilerParams(
            dimension_semantics=("parallel",),          # megacore split on v7x
            vmem_limit_bytes=vmem_limit),
        cost_estimate=pl.CostEstimate(flops=flops, transcendentals=0,
                                      bytes_accessed=bytes_accessed),
    )(x2, wqkv_t, bias2d, a_cat, b_cat)

    return out[:M].reshape(B, N, 3 * C)


def _reference(x, w_qkv, b_qkv, a_q, b_q, a_v, b_v):
    """Pure-JAX reference mirroring the PyTorch module (high precision)."""
    C = x.shape[-1]
    hp = jax.lax.Precision.HIGHEST
    qkv = jnp.einsum('bnc,oc->bno', x, w_qkv, precision=hp) + b_qkv
    new_q = jnp.einsum('bnr,or->bno',
                       jnp.einsum('bnc,rc->bnr', x, a_q, precision=hp),
                       b_q, precision=hp)
    new_v = jnp.einsum('bnr,or->bno',
                       jnp.einsum('bnc,rc->bnr', x, a_v, precision=hp),
                       b_v, precision=hp)
    qkv = qkv.at[:, :, :C].add(new_q)
    qkv = qkv.at[:, :, -C:].add(new_v)
    return qkv


if __name__ == "__main__":
    key = jax.random.PRNGKey(0)
    B, N, C, r = 2, 72, 64, 4          # M = 144 rows -> exercises multi-tile grid

    ks = jax.random.split(key, 7)
    x     = jax.random.normal(ks[0], (B, N, C), dtype=jnp.float32)
    w_qkv = jax.random.normal(ks[1], (3 * C, C), dtype=jnp.float32) * 0.05
    b_qkv = jax.random.normal(ks[2], (3 * C,), dtype=jnp.float32) * 0.05
    a_q   = jax.random.normal(ks[3], (r, C), dtype=jnp.float32) * 0.05   # LoRA A (q)
    b_q   = jax.random.normal(ks[4], (C, r), dtype=jnp.float32) * 0.05   # LoRA B (q)
    a_v   = jax.random.normal(ks[5], (r, C), dtype=jnp.float32) * 0.05   # LoRA A (v)
    b_v   = jax.random.normal(ks[6], (C, r), dtype=jnp.float32) * 0.05   # LoRA B (v)

    ref = _reference(x, w_qkv, b_qkv, a_q, b_q, a_v, b_v)

    # --- f32 MXU inputs, small tm -> grid=3 row tiles with padding (144 -> 192).
    # First call also probes pipeline_mode=pl.Buffered(1) support; falls back
    # to default double-buffering transparently if the running JAX rejects it.
    w_f32 = prepare_lora_qkv_weights(w_qkv, b_qkv, a_q, b_q, a_v, b_v,
                                     mxu_dtype=jnp.float32)
    try:
        out_f32 = jax.block_until_ready(lora_qkv(x, *w_f32, tm=64))
        sbw = True
    except Exception:
        sbw = False
        out_f32 = jax.block_until_ready(
            lora_qkv(x, *w_f32, tm=64, single_buffer_weights=False))
    assert out_f32.shape == (B, N, 3 * C)
    assert jnp.allclose(out_f32, ref, atol=1e-3, rtol=1e-3), "f32 mismatch"

    # --- bf16 MXU weights+activations (recommended on v5e/v6e/v7x), f32
    # accumulation, default tm -> exercises the >=2-grid-step clamp (grid=2).
    w_bf16 = prepare_lora_qkv_weights(w_qkv, b_qkv, a_q, b_q, a_v, b_v,
                                      mxu_dtype=jnp.bfloat16)
    out_bf16 = jax.block_until_ready(lora_qkv(x, *w_bf16,
                                              single_buffer_weights=sbw))
    assert out_bf16.shape == (B, N, 3 * C)
    assert jnp.allclose(out_bf16, ref, atol=5e-2, rtol=5e-2), "bf16 mismatch"

    # --- bf16 output epilogue (halves vst pressure + output HBM traffic).
    out_bf16o = jax.block_until_ready(lora_qkv(x, *w_bf16,
                                               out_dtype=jnp.bfloat16,
                                               single_buffer_weights=sbw))
    assert out_bf16o.dtype == jnp.bfloat16
    assert jnp.allclose(out_bf16o.astype(jnp.float32), ref,
                        atol=8e-2, rtol=8e-2), "bf16-output mismatch"

    print("KERNEL_OK")
</pallas_src>

<mosaic_0001>
module attributes {stable_mosaic.version = 11 : i64} {
  func.func @_lora_qkv_kernel(%arg0: i32, %arg1: memref<64x64xf32, #tpu.memory_space<vmem>>, %arg2: memref<64x192xf32, #tpu.memory_space<vmem>>, %arg3: memref<1x192xf32, #tpu.memory_space<vmem>>, %arg4: memref<64x8xf32, #tpu.memory_space<vmem>>, %arg5: memref<8x128xf32, #tpu.memory_space<vmem>>, %arg6: memref<64x192xf32, #tpu.memory_space<vmem>>) attributes {dimension_semantics = [#tpu.dimension_semantics<parallel>], iteration_bounds = array<i64: 3>, scalar_prefetch = 0 : i64, scratch_operands = 0 : i64, tpu.core_type = #tpu.core_type<tc>, window_params = [{transform_indices = @transform_0, window_bounds = array<i64: 64, 64>}, {pipeline_mode = #tpu.pipeline_mode<synchronous>, transform_indices = @transform_1, window_bounds = array<i64: 64, 192>}, {pipeline_mode = #tpu.pipeline_mode<synchronous>, transform_indices = @transform_2, window_bounds = array<i64: 1, 192>}, {pipeline_mode = #tpu.pipeline_mode<synchronous>, transform_indices = @transform_3, window_bounds = array<i64: 64, 8>}, {pipeline_mode = #tpu.pipeline_mode<synchronous>, transform_indices = @transform_4, window_bounds = array<i64: 8, 128>}, {transform_indices = @transform_5, window_bounds = array<i64: 64, 192>}]} {
    %c0 = arith.constant 0 : index
    %c0_0 = arith.constant 0 : index
    %0 = vector.load %arg1[%c0, %c0_0] : memref<64x64xf32, #tpu.memory_space<vmem>>, vector<64x64xf32>
    %c0_1 = arith.constant 0 : index
    %c0_2 = arith.constant 0 : index
    %1 = vector.load %arg2[%c0_1, %c0_2] : memref<64x192xf32, #tpu.memory_space<vmem>>, vector<64x192xf32>
    %cst = arith.constant dense<0.000000e+00> : vector<64x192xf32>
    %2 = tpu.matmul %0, %1, %cst {dimension_numbers = #tpu.dot_dimension_numbers<[1], [0], [0], [1], [0, 0, 1, 1], [], []>} : vector<64x64xf32>, vector<64x192xf32>, vector<64x192xf32> -> vector<64x192xf32>
    %c0_3 = arith.constant 0 : index
    %c0_4 = arith.constant 0 : index
    %3 = vector.load %arg3[%c0_3, %c0_4] : memref<1x192xf32, #tpu.memory_space<vmem>>, vector<1x192xf32>
    %4 = vector.broadcast %3 : vector<1x192xf32> to vector<64x192xf32>
    %5 = arith.addf %2, %4 : vector<64x192xf32>
    %c0_5 = arith.constant 0 : index
    %c0_6 = arith.constant 0 : index
    %6 = vector.load %arg4[%c0_5, %c0_6] : memref<64x8xf32, #tpu.memory_space<vmem>>, vector<64x8xf32>
    %cst_7 = arith.constant dense<0.000000e+00> : vector<64x8xf32>
    %7 = tpu.matmul %0, %6, %cst_7 {dimension_numbers = #tpu.dot_dimension_numbers<[1], [0], [0], [1], [0, 0, 1, 1], [], []>} : vector<64x64xf32>, vector<64x8xf32>, vector<64x8xf32> -> vector<64x8xf32>
    %c0_8 = arith.constant 0 : index
    %c0_9 = arith.constant 0 : index
    %8 = vector.load %arg5[%c0_8, %c0_9] : memref<8x128xf32, #tpu.memory_space<vmem>>, vector<8x128xf32>
    %cst_10 = arith.constant dense<0.000000e+00> : vector<64x128xf32>
    %9 = tpu.matmul %7, %8, %cst_10 {dimension_numbers = #tpu.dot_dimension_numbers<[1], [0], [0], [1], [0, 0, 1, 1], [], []>} : vector<64x8xf32>, vector<8x128xf32>, vector<64x128xf32> -> vector<64x128xf32>
    %10 = vector.extract_strided_slice %5 {offsets = [0, 0], sizes = [64, 64], strides = [1, 1]} : vector<64x192xf32> to vector<64x64xf32>
    %11 = vector.extract_strided_slice %9 {offsets = [0, 0], sizes = [64, 64], strides = [1, 1]} : vector<64x128xf32> to vector<64x64xf32>
    %12 = arith.addf %10, %11 : vector<64x64xf32>
    %13 = vector.extract_strided_slice %5 {offsets = [0, 64], sizes = [64, 64], strides = [1, 1]} : vector<64x192xf32> to vector<64x64xf32>
    %14 = vector.extract_strided_slice %5 {offsets = [0, 128], sizes = [64, 64], strides = [1, 1]} : vector<64x192xf32> to vector<64x64xf32>
    %15 = vector.extract_strided_slice %9 {offsets = [0, 64], sizes = [64, 64], strides = [1, 1]} : vector<64x128xf32> to vector<64x64xf32>
    %16 = arith.addf %14, %15 : vector<64x64xf32>
    %17 = tpu.concatenate %12, %13, %16 in 1 : vector<64x64xf32>, vector<64x64xf32>, vector<64x64xf32> -> vector<64x192xf32>
    %c0_11 = arith.constant 0 : index
    %c0_12 = arith.constant 0 : index
    %18 = vector.load %arg6[%c0_11, %c0_12] : memref<64x192xf32, #tpu.memory_space<vmem>>, vector<64x192xf32>
    tpu.vector_store %arg6[%c0_11, %c0_12], %17 {strides = array<i32>} : memref<64x192xf32, #tpu.memory_space<vmem>>, vector<64x192xf32>,
    return
  }
  func.func @transform_0(%arg0: i32) -> (i32, i32) {
    %c0_i32 = arith.constant 0 : i32
    %c0_i32_0 = arith.constant 0 : i32
    return %arg0, %c0_i32 : i32, i32
  }
  func.func @transform_1(%arg0: i32) -> (i32, i32) {
    %c0_i32 = arith.constant 0 : i32
    %c0_i32_0 = arith.constant 0 : i32
    %c0_i32_1 = arith.constant 0 : i32
    return %c0_i32, %c0_i32_0 : i32, i32
  }
  func.func @transform_2(%arg0: i32) -> (i32, i32) {
    %c0_i32 = arith.constant 0 : i32
    %c0_i32_0 = arith.constant 0 : i32
    %c0_i32_1 = arith.constant 0 : i32
    return %c0_i32, %c0_i32_0 : i32, i32
  }
  func.func @transform_3(%arg0: i32) -> (i32, i32) {
    %c0_i32 = arith.constant 0 : i32
    %c0_i32_0 = arith.constant 0 : i32
    %c0_i32_1 = arith.constant 0 : i32
    return %c0_i32, %c0_i32_0 : i32, i32
  }
  func.func @transform_4(%arg0: i32) -> (i32, i32) {
    %c0_i32 = arith.constant 0 : i32
    %c0_i32_0 = arith.constant 0 : i32
    %c0_i32_1 = arith.constant 0 : i32
    return %c0_i32, %c0_i32_0 : i32, i32
  }
  func.func @transform_5(%arg0: i32) -> (i32, i32) {
    %c0_i32 = arith.constant 0 : i32
    %c0_i32_0 = arith.constant 0 : i32
    return %arg0, %c0_i32 : i32, i32
  }
}

module attributes {stable_mosaic.version = 11 : i64} {
  func.func @_lora_qkv_kernel(%arg0: i32, %arg1: memref<64x64xf32, #tpu.memory_space<vmem>>, %arg2: memref<64x192xf32, #tpu.memory_space<vmem>>, %arg3: memref<1x192xf32, #tpu.memory_space<vmem>>, %arg4: memref<64x8xf32, #tpu.memory_space<vmem>>, %arg5: memref<8x128xf32, #tpu.memory_space<vmem>>, %arg6: memref<64x192xf32, #tpu.memory_space<vmem>>) attributes {dimension_semantics = [#tpu.dimension_semantics<parallel>], iteration_bounds = array<i64: 3>, scalar_prefetch = 0 : i64, scratch_operands = 0 : i64, tpu.core_type = #tpu.core_type<tc>, window_params = [{transform_indices = @transform_0, window_bounds = array<i64: 64, 64>}, {pipeline_mode = #tpu.pipeline_mode<synchronous>, transform_indices = @transform_1, window_bounds = array<i64: 64, 192>}, {pipeline_mode = #tpu.pipeline_mode<synchronous>, transform_indices = @transform_2, window_bounds = array<i64: 1, 192>}, {pipeline_mode = #tpu.pipeline_mode<synchronous>, transform_indices = @transform_3, window_bounds = array<i64: 64, 8>}, {pipeline_mode = #tpu.pipeline_mode<synchronous>, transform_indices = @transform_4, window_bounds = array<i64: 8, 128>}, {transform_indices = @transform_5, window_bounds = array<i64: 64, 192>}]} {
    %c0 = arith.constant 0 : index
    %c0_0 = arith.constant 0 : index
    %0 = vector.load %arg1[%c0, %c0_0] : memref<64x64xf32, #tpu.memory_space<vmem>>, vector<64x64xf32>
    %c0_1 = arith.constant 0 : index
    %c0_2 = arith.constant 0 : index
    %1 = vector.load %arg2[%c0_1, %c0_2] : memref<64x192xf32, #tpu.memory_space<vmem>>, vector<64x192xf32>
    %cst = arith.constant dense<0.000000e+00> : vector<64x192xf32>
    %2 = tpu.matmul %0, %1, %cst {dimension_numbers = #tpu.dot_dimension_numbers<[1], [0], [0], [1], [0, 0, 1, 1], [], []>} : vector<64x64xf32>, vector<64x192xf32>, vector<64x192xf32> -> vector<64x192xf32>
    %c0_3 = arith.constant 0 : index
    %c0_4 = arith.constant 0 : index
    %3 = vector.load %arg3[%c0_3, %c0_4] : memref<1x192xf32, #tpu.memory_space<vmem>>, vector<1x192xf32>
    %4 = vector.broadcast %3 : vector<1x192xf32> to vector<64x192xf32>
    %5 = arith.addf %2, %4 : vector<64x192xf32>
    %c0_5 = arith.constant 0 : index
    %c0_6 = arith.constant 0 : index
    %6 = vector.load %arg4[%c0_5, %c0_6] : memref<64x8xf32, #tpu.memory_space<vmem>>, vector<64x8xf32>
    %cst_7 = arith.constant dense<0.000000e+00> : vector<64x8xf32>
    %7 = tpu.matmul %0, %6, %cst_7 {dimension_numbers = #tpu.dot_dimension_numbers<[1], [0], [0], [1], [0, 0, 1, 1], [], []>} : vector<64x64xf32>, vector<64x8xf32>, vector<64x8xf32> -> vector<64x8xf32>
    %c0_8 = arith.constant 0 : index
    %c0_9 = arith.constant 0 : index
    %8 = vector.load %arg5[%c0_8, %c0_9] : memref<8x128xf32, #tpu.memory_space<vmem>>, vector<8x128xf32>
    %cst_10 = arith.constant dense<0.000000e+00> : vector<64x128xf32>
    %9 = tpu.matmul %7, %8, %cst_10 {dimension_numbers = #tpu.dot_dimension_numbers<[1], [0], [0], [1], [0, 0, 1, 1], [], []>} : vector<64x8xf32>, vector<8x128xf32>, vector<64x128xf32> -> vector<64x128xf32>
    %10 = vector.extract_strided_slice %5 {offsets = [0, 0], sizes = [64, 64], strides = [1, 1]} : vector<64x192xf32> to vector<64x64xf32>
    %11 = vector.extract_strided_slice %9 {offsets = [0, 0], sizes = [64, 64], strides = [1, 1]} : vector<64x128xf32> to vector<64x64xf32>
    %12 = arith.addf %10, %11 : vector<64x64xf32>
    %13 = vector.extract_strided_slice %5 {offsets = [0, 64], sizes = [64, 64], strides = [1, 1]} : vector<64x192xf32> to vector<64x64xf32>
    %14 = vector.extract_strided_slice %5 {offsets = [0, 128], sizes = [64, 64], strides = [1, 1]} : vector<64x192xf32> to vector<64x64xf32>
    %15 = vector.extract_strided_slice %9 {offsets = [0, 64], sizes = [64, 64], strides = [1, 1]} : vector<64x128xf32> to vector<64x64xf32>
    %16 = arith.addf %14, %15 : vector<64x64xf32>
    %17 = tpu.concatenate %12, %13, %16 in 1 : vector<64x64xf32>, vector<64x64xf32>, vector<64x64xf32> -> vector<64x192xf32>
    %c0_11 = arith.constant 0 : index
    %c0_12 = arith.constant 0 : index
    %18 = vector.load %arg6[%c0_11, %c0_12] : memref<64x192xf32, #tpu.memory_space<vmem>>, vector<64x192xf32>
    tpu.vector_store %arg6[%c0_11, %c0_12], %17 {strides = array<i32>} : memref<64x192xf32, #tpu.memory_space<vmem>>, vector<64x192xf32>,
    return
  }
  func.func @transform_0(%arg0: i32) -> (i32, i32) {
    %c0_i32 = arith.constant 0 : i32
    %c0_i32_0 = arith.constant 0 : i32
    return %arg0, %c0_i32 : i32, i32
  }
  func.func @transform_1(%arg0: i32) -> (i32, i32) {
    %c0_i32 = arith.constant 0 : i32
    %c0_i32_0 = arith.constant 0 : i32
    %c0_i32_1 = arith.constant 0 : i32
    return %c0_i32, %c0_i32_0 : i32, i32
  }
  func.func @transform_2(%arg0: i32) -> (i32, i32) {
    %c0_i32 = arith.constant 0 : i32
    %c0_i32_0 = arith.constant 0 : i32
    %c0_i32_1 = arith.constant 0 : i32
    return %c0_i32, %c0_i32_0 : i32, i32
  }
  func.func @transform_3(%arg0: i32) -> (i32, i32) {
    %c0_i32 = arith.constant 0 : i32
    %c0_i32_0 = arith.constant 0 : i32
    %c0_i32_1 = arith.constant 0 : i32
    return %c0_i32, %c0_i32_0 : i32, i32
  }
  func.func @transform_4(%arg0: i32) -> (i32, i32) {
    %c0_i32 = arith.constant 0 : i32
    %c0_i32_0 = arith.constant 0 : i32
    %c0_i32_1 = arith.constant 0 : i32
    return %c0_i32, %c0_i32_0 : i32, i32
  }
  func.func @transform_5(%arg0: i32) -> (i32, i32) {
    %c0_i32 = arith.constant 0 : i32
    %c0_i32_0 = arith.constant 0 : i32
    return %arg0, %c0_i32 : i32, i32
  }
}

</mosaic_0001>

<bundles_post_ra>
// kernel: lora_qkv.1
= control target key start
LH: loop header
LB: loop body
LE: loop exit
PB: predicated region body
PF: predicated region fallthrough
CT: control target
= control target key end

     0   :  { %s964_s18 = smov 0   ;;  %s1171_s0 = inlined_call_operand.vmem [shape: f32[192,64], index: 0, kind: input, shape index: {}]   ;;  %s1172_s1 = inlined_call_operand.vmem [shape: f32[64,192], index: 1, kind: input, shape index: {}]   ;;  %s1173_s2 = inlined_call_operand.vmem [shape: f32[1,192], index: 2, kind: input, shape index: {}]   ;;  %s1174_s3 = inlined_call_operand.vmem [shape: f32[64,8], index: 3, kind: input, shape index: {}]   ;;  %s1175_s4 = inlined_call_operand.vmem [shape: f32[8,128], index: 4, kind: input, shape index: {}]   ;;  %s1176_s5 = inlined_call_operand.vmem [shape: f32[192,192], index: 5, kind: output, shape index: {}]  }
   0x1 LB: > { %s778_s19 = sadd.s32 4294967295, %s930_s18   ;;  %p782_p0 = scmp.ge.s32.totalorder %s930_s18, 1  ;;  %s930_s18 = sphi %s964_s18, %s15_s18  }
   0x2   : > { %p188_p1 = scmp.lt.s32.totalorder %s930_s18, 4 }
   0x4   : > { %p189_p2 = pnand %p782_p0, %p188_p1 }
   0x5   : > { %v404_v0 = vld [vmem:[%s1174_s3] sm:$0xff] (!%p189_p2)  ;;  %v405_v1 = vld [vmem:[%s1174_s3 + $0x8] sm:$0xff] (!%p189_p2)  ;;  %v406_v2 = vld [vmem:[%s1174_s3 + $0x10] sm:$0xff] (!%p189_p2)  ;;  %s783_s26 = sshll.u32 (!%p189_p2), %s778_s19, 3  ;;  %v932_v5 = vmov (!%p189_p2), 0.0   ;;  %vm266_vm0 = vcmask (!%p189_p2), 523264   ;;  %v256_v46 = vlaneseq (!%p189_p2) }
   0x6   : > { %192 = sbr.rel (%p189_p2) target bundleno = 584 (0x248), region = 40  ;;  %v898_v3 = vpack.c.bf16 (!%p189_p2), %v405_v1, %v404_v0  ;;  %v407_v4 = vld [vmem:[%s1174_s3 + $0x18] sm:$0xff] (!%p189_p2)  ;;  %p218_p3 = scmp.lt.s32.totalorder (!%p189_p2), %s783_s26, 23  ;;  %355 = vmatprep.mubr.f32.mxu0 (!%p189_p2), %v932_v5  ;;  %v408_v7 = vld [vmem:[%s1174_s3 + $0x20] sm:$0xff] (!%p189_p2)  ;;  %v409_v8 = vld [vmem:[%s1174_s3 + $0x28] sm:$0xff] (!%p189_p2)  ;;  %vm518_vm1 = vcmask (!%p189_p2), 64512  }
   0x7   : > { %v902_v6 = vpack.c.bf16 (!%p189_p2), %v407_v4, %v406_v2  ;;  %v239_v9 = vld [vmem:[%s1172_s1 + $0x8] sm:$0xff] (!%p189_p2)  ;;  %v241_v10 = vld [vmem:[%s1172_s1 + $0x18] sm:$0xff] (!%p189_p2)  ;;  %v238_v11 = vld [vmem:[%s1172_s1] sm:$0xff] (!%p189_p2)  ;;  %v906_v18 = vpack.c.bf16 (!%p189_p2), %v409_v8, %v408_v7  ;;  %v257_v47 = vshrl.u32 (!%p189_p2), %v256_v46, 7  ;;  %s933_s10 = smov (!%p189_p2), 64  }
   0x8   : > { %899 = vmatprep.subr.bf16.mxu1 (!%p189_p2), %v898_v3  ;;  %v240_v12 = vld [vmem:[%s1172_s1 + $0x10] sm:$0xff] (!%p189_p2)  ;;  %v882_v13 = vpack.c.bf16 (!%p189_p2), %v241_v10, %v239_v9  ;;  %v243_v15 = vld [vmem:[%s1172_s1 + $0x28] sm:$0xff] (!%p189_p2)  ;;  %v245_v16 = vld [vmem:[%s1172_s1 + $0x38] sm:$0xff] (!%p189_p2) }
   0x9   : > { %901 = vmatpush3.bf16.msra.mxu1 (!%p189_p2), %v898_v3  ;;  %v884_v14 = vpack.c.bf16 (!%p189_p2), %v240_v12, %v238_v11  ;;  %v242_v17 = vld [vmem:[%s1172_s1 + $0x20] sm:$0xff] (!%p189_p2)  ;;  %v886_v19 = vpack.c.bf16 (!%p189_p2), %v245_v16, %v243_v15  ;;  %v244_v20 = vld [vmem:[%s1172_s1 + $0x30] sm:$0xff] (!%p189_p2)  ;;  %v247_v21 = vld [vmem:[%s1172_s1 + $0x48] sm:$0xff] (!%p189_p2)  ;;  %v262_v48 = vsub.s32 (!%p189_p2), 1, %v257_v47 }
   0xa   : > { %903 = vmatprep.subr.bf16.mxu1 (!%p189_p2), %v902_v6  ;;  %v249_v22 = vld [vmem:[%s1172_s1 + $0x58] sm:$0xff] (!%p189_p2)  ;;  %v410_v23 = vld [vmem:[%s1174_s3 + $0x30] sm:$0xff] (!%p189_p2)  ;;  %883 = vmatprep.subr.bf16.mxu0 (!%p189_p2), %v882_v13  ;;  %v888_v26 = vpack.c.bf16 (!%p189_p2), %v244_v20, %v242_v17  ;;  %v246_v28 = vld [vmem:[%s1172_s1 + $0x40] sm:$0xff] (!%p189_p2)  ;;  %v258_v17 = vsub.s32 (!%p189_p2), 0, %v257_v47 }
   0xb   : > { %v411_v24 = vld [vmem:[%s1174_s3 + $0x38] sm:$0xff] (!%p189_p2)  ;;  %885 = vmatpush1.bf16.msra.mxu0 (!%p189_p2), %v884_v14  ;;  %v890_v27 = vpack.c.bf16 (!%p189_p2), %v249_v22, %v247_v21  ;;  %v248_v29 = vld [vmem:[%s1172_s1 + $0x50] sm:$0xff] (!%p189_p2)  ;;  %v251_v31 = vld [vmem:[%s1172_s1 + $0x68] sm:$0xff] (!%p189_p2) }
   0xc   : > { %v910_v30 = vpack.c.bf16 (!%p189_p2), %v411_v24, %v410_v23  ;;  %887 = vmatprep.subr.bf16.mxu0 (!%p189_p2), %v886_v19  ;;  %v253_v32 = vld [vmem:[%s1172_s1 + $0x78] sm:$0xff] (!%p189_p2)  ;;  %v892_v33 = vpack.c.bf16 (!%p189_p2), %v248_v29, %v246_v28  ;;  %v250_v35 = vld [vmem:[%s1172_s1 + $0x60] sm:$0xff] (!%p189_p2)  ;;  %v252_v36 = vld [vmem:[%s1172_s1 + $0x70] sm:$0xff] (!%p189_p2) }
   0xd   : > { %s1178_s26 = smov (!%p218_p3, %s783_s26), 23  ;;  %905 = vmatpush3.bf16.msra.mxu1 %v902_v6  ;;  %v894_v34 = vpack.c.bf16 %v253_v32, %v251_v31  ;;  %v517_v37 = vld [vmem:[%s1175_s4] sm:$0xff]  ;;  %v896_v38 = vpack.c.bf16 %v252_v36, %v250_v35 }
   0xe   : > { %s784_s23 = sshll.u32 %s1178_s26, 3  ;;  %907 = vmatprep.subr.bf16.mxu1 %v906_v18  ;;  %v254_v49 = vld [vmem:[%s1173_s2] sm:$0x3]  ;;  %s814_s6 = sshll.u32 %s1178_s26, 4 }
   0xf   : > { %s1033_s12 = scalar_lea.vmem %s1171_s0, %s784_s23  ;;  %889 = vmatpush1.bf16.msra.mxu0 %v888_v26  ;;  %v263_v50 = vrot.slane %v254_v49, %v262_v48  ;;  %s1116_s9 = scalar_lea.vmem %s1176_s5, %s814_s6 }
  0x10   : > { %v230_v25 = vld [vmem:[%s1033_s12] sm:$0xff]  ;;  %891 = vmatprep.subr.bf16.mxu0 %v890_v27  ;;  %v231_v39 = vld [vmem:[%s1033_s12 + $0x8] sm:$0xff]  ;;  %v232_v40 = vld [vmem:[%s1033_s12 + $0x10] sm:$0xff] }
  0x11   : > { %856 = vmatprep.mubr.msk.f32.mxu1 %vm266_vm0, %v230_v25  ;;  %909 = vmatpush3.bf16.msra.mxu1 %v906_v18  ;;  %v233_v41 = vld [vmem:[%s1033_s12 + $0x18] sm:$0xff]  ;;  %v234_v42 = vld [vmem:[%s1033_s12 + $0x20] sm:$0xff]  ;;  %v235_v43 = vld [vmem:[%s1033_s12 + $0x28] sm:$0xff]  ;;  %v259_v18 = vrot.slane %v254_v49, %v258_v17 }
  0x12   : > { %911 = vmatprep.subr.bf16.mxu1 %v910_v30  ;;  %v236_v44 = vld [vmem:[%s1033_s12 + $0x30] sm:$0xff]  ;;  %v237_v45 = vld [vmem:[%s1033_s12 + $0x38] sm:$0xff] }
  0x13   : > { %893 = vmatpush1.bf16.msra.mxu0 %v892_v33 }
  0x14   : > { %895 = vmatprep.subr.bf16.mxu0 %v894_v34 }
  0x15   : > { %913 = vmatpush3.bf16.msra.mxu1 %v910_v30 }
  0x16   : > { %868 = vmatprep.subr.mxu1 %v517_v37 }
  0x17   : > { %897 = vmatpush1.bf16.msra.mxu0 %v896_v38 }
  0x18   : > { %857 = vmatmul.mubr.msk.f32.vlgmr.msra.gmra.mrb[0].mxu1 %vm266_vm0, %v231_v39 }
  0x19   : > { %859 = vmatprep.mubr.msk.f32.mxu1 %vm266_vm0, %v232_v40  ;;  %869 = vmatpush3.msra.mxu1 %v517_v37 }
  0x1a   : > { %788 = vmatmul.mubr.msk.f32.vlgmr.msra.gmra.mrb[0].mxu0 %vm266_vm0, %v230_v25 }
  0x1b   : > { %361 = vmatprep.mubr.f32.mxu0 %v932_v5 }
  0x1c   : > { %860 = vmatmul.mubr.msk.f32.gmra.mrb[2].mxu1 %vm266_vm0, %v233_v41 }
  0x1d   : > { %862 = vmatprep.mubr.msk.f32.mxu1 %vm266_vm0, %v234_v42 }
  0x1e   : > { %789 = vmatmul.mubr.msk.f32.gmra.mrb[2].mxu0 %vm266_vm0, %v231_v39 }
  0x1f   : > { %367 = vmatprep.mubr.f32.mxu0 %v932_v5 }
  0x20   : > { %863 = vmatmul.mubr.msk.f32.gmra.mrb[4].mxu1 %vm266_vm0, %v235_v43 }
  0x21   : > { %865 = vmatprep.mubr.msk.f32.mxu1 %vm266_vm0, %v236_v44 }
  0x22   : > { %790 = vmatmul.mubr.msk.f32.gmra.mrb[4].mxu0 %vm266_vm0, %v232_v40 }
  0x23   : > { %373 = vmatprep.mubr.f32.mxu0 %v932_v5 }
  0x24   : > { %866 = vmatmul.mubr.msk.f32.gmra.mrb[6].mxu1 %vm266_vm0, %v237_v45 }
  0x26   : > { %791 = vmatmul.mubr.msk.f32.gmra.mrb[6].mxu0 %vm266_vm0, %v233_v41 }
  0x27   : > { %379 = vmatprep.mubr.f32.mxu0 %v932_v5 }
  0x2a   : > { %792 = vmatmul.mubr.msk.f32.gmra.mrb[8].mxu0 %vm266_vm0, %v234_v42 }
  0x2b   : > { %385 = vmatprep.mubr.f32.mxu0 %v932_v5 }
  0x2e   : > { %793 = vmatmul.mubr.msk.f32.gmra.mrb[10].mxu0 %vm266_vm0, %v235_v43 }
  0x2f   : > { %391 = vmatprep.mubr.f32.mxu0 %v932_v5 }
  0x32   : > { %794 = vmatmul.mubr.msk.f32.gmra.mrb[12].mxu0 %vm266_vm0, %v236_v44 }
  0x33   : > { %397 = vmatprep.mubr.f32.mxu0 %v932_v5 }
  0x36   : > { %795 = vmatmul.mubr.msk.f32.gmra.mrb[14].mxu0 %vm266_vm0, %v237_v45 }
  0xeb   : > { %v858_v51 = vpop.f32.mrb[0].mxu1 }
  0xec   : > { %v478_v52 = vpop.f32.mrb[1].mxu1 }
  0xed   : > { %870 = vmatprep.mubr.msk.f32.mxu1 %vm518_vm1, %v478_v52  ;;  %v357_v53 = vpop.f32.mrb[0].mxu0 }
  0xee   : > { %871 = vmatmul.mubr.msk.f32.vlgmr.msra.gmra.mrb[8].mxu1 %vm518_vm1, %v858_v51  ;;  %v359_v55 = vpop.f32.mrb[1].mxu0  ;;  %v358_v20 = vadd.f32 %v357_v53, %v259_v18 }
  0xef   : > { %v861_v54 = vpop.f32.mrb[2].mxu1  ;;  %v1092_v57 = vadd.f32 %v359_v55, %v263_v50 }
  0xf0   : > { %v488_v56 = vpop.f32.mrb[3].mxu1 }
  0xf1   : > { %873 = vmatprep.mubr.msk.f32.mxu1 %vm518_vm1, %v488_v56  ;;  %v363_v58 = vpop.f32.mrb[2].mxu0 }
  0xf2   : > { %874 = vmatmul.mubr.msk.f32.gmra.mrb[10].mxu1 %vm518_vm1, %v861_v54  ;;  %v365_v60 = vpop.f32.mrb[3].mxu0  ;;  %v364_v19 = vadd.f32 %v363_v58, %v259_v18 }
  0xf3   : > { %v864_v59 = vpop.f32.mrb[4].mxu1  ;;  %v1096_v62 = vadd.f32 %v365_v60, %v263_v50 }
  0xf4   : > { %v498_v61 = vpop.f32.mrb[5].mxu1 }
  0xf5   : > { %876 = vmatprep.mubr.msk.f32.mxu1 %vm518_vm1, %v498_v61  ;;  %v369_v63 = vpop.f32.mrb[4].mxu0 }
  0xf6   : > { %877 = vmatmul.mubr.msk.f32.gmra.mrb[12].mxu1 %vm518_vm1, %v864_v59  ;;  %v371_v2 = vpop.f32.mrb[5].mxu0  ;;  %v370_v27 = vadd.f32 %v369_v63, %v259_v18 }
  0xf7   : > { %v867_v0 = vpop.f32.mrb[6].mxu1  ;;  %v1102_v4 = vadd.f32 %v371_v2, %v263_v50 }
  0xf8   : > { %v508_v1 = vpop.f32.mrb[7].mxu1 }
  0xf9   : > { %879 = vmatprep.mubr.msk.f32.mxu1 %vm518_vm1, %v508_v1  ;;  %v375_v3 = vpop.f32.mrb[6].mxu0 }
  0xfa   : > { %880 = vmatmul.mubr.msk.f32.gmra.mrb[14].mxu1 %vm518_vm1, %v867_v0  ;;  %v377_v5 = vpop.f32.mrb[7].mxu0  ;;  %v376_v25 = vadd.f32 %v375_v3, %v259_v18 }
  0xfb   : > { %v1104_v6 = vadd.f32 %v377_v5, %v263_v50 }
  0xfd   : > { %v381_v7 = vpop.f32.mrb[8].mxu0 }
  0xfe   : > { %v383_v8 = vpop.f32.mrb[9].mxu0  ;;  %v382_v35 = vadd.f32 %v381_v7, %v259_v18 }
  0xff   : > { %v1106_v11 = vadd.f32 %v383_v8, %v263_v50 }
 0x101   : > { %v387_v9 = vpop.f32.mrb[10].mxu0 }
 0x102   : > { %v389_v10 = vpop.f32.mrb[11].mxu0  ;;  %v388_v34 = vadd.f32 %v387_v9, %v259_v18 }
 0x103   : > { %v1108_v12 = vadd.f32 %v389_v10, %v263_v50 }
 0x105   : > { %v393_v13 = vpop.f32.mrb[12].mxu0 }
 0x106   : > { %v395_v14 = vpop.f32.mrb[13].mxu0  ;;  %v394_v43 = vadd.f32 %v393_v13, %v259_v18 }
 0x107   : > { %v1110_v16 = vadd.f32 %v395_v14, %v263_v50 }
 0x109   : > { %v399_v15 = vpop.f32.mrb[14].mxu0 }
 0x10a   : > { %v401_v22 = vpop.f32.mrb[15].mxu0  ;;  %v400_v42 = vadd.f32 %v399_v15, %v259_v18 }
 0x10b   : > { %v1119_v26 = vadd.f32 %v401_v22, %v263_v50 }
 0x1c1   : > { %v872_v21 = vpop.f32.mrb[8].mxu1 }
 0x1c2   : > { %v649_v23 = vadd.f32 %v872_v21, %v364_v19  ;;  %666 = vrot.lane.b32.xlu0 %v872_v21, %s933_s10  ;;  %v609_v24 = vpop.f32.mrb[9].mxu1 }
 0x1c3   : > { %v648_v28 = vadd.f32 %v609_v24, %v358_v20 }
 0x1c4   : > { %v697_v29 = vsel %vm266_vm0, %v649_v23, %v364_v19 }
 0x1c5   : > { %706 = vst [vmem:[%s1116_s9 + $0x10] sm:$0xff] %v697_v29  ;;  %v696_v30 = vsel %vm266_vm0, %v648_v28, %v358_v20  ;;  %v875_v31 = vpop.f32.mrb[10].mxu1 }
 0x1c6   : > { %704 = vst [vmem:[%s1116_s9] sm:$0xff] %v696_v30  ;;  %v651_v32 = vadd.f32 %v875_v31, %v376_v25  ;;  %664 = vrot.lane.b32.xlu0 %v609_v24, %s933_s10  ;;  %670 = vrot.lane.b32.xlu1 %v875_v31, %s933_s10  ;;  %v619_v33 = vpop.f32.mrb[11].mxu1 }
 0x1c7   : > { %v650_v36 = vadd.f32 %v619_v33, %v370_v27 }
 0x1c8   : > { %v699_v37 = vsel %vm266_vm0, %v651_v32, %v376_v25 }
 0x1c9   : > { %710 = vst [vmem:[%s1116_s9 + $0x30] sm:$0xff] %v699_v37  ;;  %v698_v38 = vsel %vm266_vm0, %v650_v36, %v370_v27  ;;  %v878_v39 = vpop.f32.mrb[12].mxu1 }
 0x1ca   : > { %708 = vst [vmem:[%s1116_s9 + $0x20] sm:$0xff] %v698_v38  ;;  %v653_v40 = vadd.f32 %v878_v39, %v388_v34  ;;  %668 = vrot.lane.b32.xlu1 %v619_v33, %s933_s10  ;;  %v629_v41 = vpop.f32.mrb[13].mxu1 }
 0x1cb   : > { %v652_v44 = vadd.f32 %v629_v41, %v382_v35  ;;  %672 = vrot.lane.b32.xlu0 %v629_v41, %s933_s10 }
 0x1cc   : > { %v701_v45 = vsel %vm266_vm0, %v653_v40, %v388_v34 }
 0x1cd   : > { %714 = vst [vmem:[%s1116_s9 + $0x50] sm:$0xff] %v701_v45  ;;  %v700_v46 = vsel %vm266_vm0, %v652_v44, %v382_v35  ;;  %v881_v47 = vpop.f32.mrb[14].mxu1 }
 0x1ce   : > { %712 = vst [vmem:[%s1116_s9 + $0x40] sm:$0xff] %v700_v46  ;;  %v655_v48 = vadd.f32 %v881_v47, %v400_v42  ;;  %674 = vrot.lane.b32.xlu1 %v878_v39, %s933_s10  ;;  %v639_v49 = vpop.f32.mrb[15].mxu1 }
 0x1cf   : > { %v654_v50 = vadd.f32 %v639_v49, %v394_v43  ;;  %676 = vrot.lane.b32.xlu0 %v639_v49, %s933_s10 }
 0x1d0   : > { %v703_v51 = vsel %vm266_vm0, %v655_v48, %v400_v42 }
 0x1d1   : > { %718 = vst [vmem:[%s1116_s9 + $0x70] sm:$0xff] %v703_v51  ;;  %v702_v52 = vsel %vm266_vm0, %v654_v50, %v394_v43 }
 0x1d2   : > { %716 = vst [vmem:[%s1116_s9 + $0x60] sm:$0xff] %v702_v52  ;;  %678 = vrot.lane.b32.xlu1 %v881_v47, %s933_s10 }
 0x234   : > { %v667_v53 = vpop.permute.xlu0 %666 }
 0x235   : > { %v689_v54 = vadd.f32 %v667_v53, %v1096_v62 }
 0x237   : > { %707 = vst.msk [vmem:[%s1116_s9 + $0x18] sm:$0xff] %vm266_vm0, %v689_v54 }
 0x238   : > { %v665_v55 = vpop.permute.xlu0 %664  ;;  %v671_v56 = vpop.permute.xlu1 %670 }
 0x239   : > { %v688_v58 = vadd.f32 %v665_v55, %v1092_v57  ;;  %v691_v59 = vadd.f32 %v671_v56, %v1104_v6 }
 0x23b   : > { %705 = vst.msk [vmem:[%s1116_s9 + $0x8] sm:$0xff] %vm266_vm0, %v688_v58  ;;  %711 = vst.msk [vmem:[%s1116_s9 + $0x38] sm:$0xff] %vm266_vm0, %v691_v59 }
 0x23c   : > { %v669_v60 = vpop.permute.xlu1 %668 }
 0x23d   : > { %v690_v61 = vadd.f32 %v669_v60, %v1102_v4  ;;  %v673_v63 = vpop.permute.xlu0 %672 }
 0x23e   : > { %v692_v62 = vadd.f32 %v673_v63, %v1106_v11 }
 0x23f   : > { %709 = vst.msk [vmem:[%s1116_s9 + $0x28] sm:$0xff] %vm266_vm0, %v690_v61 }
 0x240   : > { %713 = vst.msk [vmem:[%s1116_s9 + $0x48] sm:$0xff] %vm266_vm0, %v692_v62  ;;  %v675_v0 = vpop.permute.xlu1 %674 }
 0x241   : > { %v693_v57 = vadd.f32 %v675_v0, %v1108_v12  ;;  %v677_v1 = vpop.permute.xlu0 %676 }
 0x242   : > { %v694_v2 = vadd.f32 %v677_v1, %v1110_v16 }
 0x243   : > { %715 = vst.msk [vmem:[%s1116_s9 + $0x58] sm:$0xff] %vm266_vm0, %v693_v57 }
 0x244   : > { %717 = vst.msk [vmem:[%s1116_s9 + $0x68] sm:$0xff] %vm266_vm0, %v694_v2  ;;  %v679_v3 = vpop.permute.xlu1 %678 }
 0x245   : > { %v695_v4 = vadd.f32 %v679_v3, %v1119_v26 }
 0x247   : > { %719 = vst.msk [vmem:[%s1116_s9 + $0x78] sm:$0xff] %vm266_vm0, %v695_v4 }
 0x248 PF: > { %s15_s18 = sadd.s32 1, %s930_s18  }
 0x249   : > { %p12_p4 = scmp.ge.s32.totalorder %s15_s18, 5  }
 0x24b   :  { %14 = sbr.rel (!%p12_p4) target bundleno = 1 (0x1), region = 70 }

// kernel: lora_qkv.1
= control target key start
LH: loop header
LB: loop body
LE: loop exit
PB: predicated region body
PF: predicated region fallthrough
CT: control target
= control target key end

     0   :  { %s964_s18 = smov 0   ;;  %s1171_s0 = inlined_call_operand.vmem [shape: f32[192,64], index: 0, kind: input, shape index: {}]   ;;  %s1172_s1 = inlined_call_operand.vmem [shape: f32[64,192], index: 1, kind: input, shape index: {}]   ;;  %s1173_s2 = inlined_call_operand.vmem [shape: f32[1,192], index: 2, kind: input, shape index: {}]   ;;  %s1174_s3 = inlined_call_operand.vmem [shape: f32[64,8], index: 3, kind: input, shape index: {}]   ;;  %s1175_s4 = inlined_call_operand.vmem [shape: f32[8,128], index: 4, kind: input, shape index: {}]   ;;  %s1176_s5 = inlined_call_operand.vmem [shape: f32[192,192], index: 5, kind: output, shape index: {}]  }
   0x1 LB: > { %s778_s19 = sadd.s32 4294967295, %s930_s18   ;;  %p782_p0 = scmp.ge.s32.totalorder %s930_s18, 1  ;;  %s930_s18 = sphi %s964_s18, %s15_s18  }
   0x2   : > { %p188_p1 = scmp.lt.s32.totalorder %s930_s18, 4 }
   0x4   : > { %p189_p2 = pnand %p782_p0, %p188_p1 }
   0x5   : > { %v404_v0 = vld [vmem:[%s1174_s3] sm:$0xff] (!%p189_p2)  ;;  %v405_v1 = vld [vmem:[%s1174_s3 + $0x8] sm:$0xff] (!%p189_p2)  ;;  %v406_v2 = vld [vmem:[%s1174_s3 + $0x10] sm:$0xff] (!%p189_p2)  ;;  %s783_s26 = sshll.u32 (!%p189_p2), %s778_s19, 3  ;;  %v932_v5 = vmov (!%p189_p2), 0.0   ;;  %vm266_vm0 = vcmask (!%p189_p2), 523264   ;;  %v256_v46 = vlaneseq (!%p189_p2) }
   0x6   : > { %192 = sbr.rel (%p189_p2) target bundleno = 584 (0x248), region = 40  ;;  %v898_v3 = vpack.c.bf16 (!%p189_p2), %v405_v1, %v404_v0  ;;  %v407_v4 = vld [vmem:[%s1174_s3 + $0x18] sm:$0xff] (!%p189_p2)  ;;  %p218_p3 = scmp.lt.s32.totalorder (!%p189_p2), %s783_s26, 23  ;;  %355 = vmatprep.mubr.f32.mxu0 (!%p189_p2), %v932_v5  ;;  %v408_v7 = vld [vmem:[%s1174_s3 + $0x20] sm:$0xff] (!%p189_p2)  ;;  %v409_v8 = vld [vmem:[%s1174_s3 + $0x28] sm:$0xff] (!%p189_p2)  ;;  %vm518_vm1 = vcmask (!%p189_p2), 64512  }
   0x7   : > { %v902_v6 = vpack.c.bf16 (!%p189_p2), %v407_v4, %v406_v2  ;;  %v239_v9 = vld [vmem:[%s1172_s1 + $0x8] sm:$0xff] (!%p189_p2)  ;;  %v241_v10 = vld [vmem:[%s1172_s1 + $0x18] sm:$0xff] (!%p189_p2)  ;;  %v238_v11 = vld [vmem:[%s1172_s1] sm:$0xff] (!%p189_p2)  ;;  %v906_v18 = vpack.c.bf16 (!%p189_p2), %v409_v8, %v408_v7  ;;  %v257_v47 = vshrl.u32 (!%p189_p2), %v256_v46, 7  ;;  %s933_s10 = smov (!%p189_p2), 64  }
   0x8   : > { %899 = vmatprep.subr.bf16.mxu1 (!%p189_p2), %v898_v3  ;;  %v240_v12 = vld [vmem:[%s1172_s1 + $0x10] sm:$0xff] (!%p189_p2)  ;;  %v882_v13 = vpack.c.bf16 (!%p189_p2), %v241_v10, %v239_v9  ;;  %v243_v15 = vld [vmem:[%s1172_s1 + $0x28] sm:$0xff] (!%p189_p2)  ;;  %v245_v16 = vld [vmem:[%s1172_s1 + $0x38] sm:$0xff] (!%p189_p2) }
   0x9   : > { %901 = vmatpush3.bf16.msra.mxu1 (!%p189_p2), %v898_v3  ;;  %v884_v14 = vpack.c.bf16 (!%p189_p2), %v240_v12, %v238_v11  ;;  %v242_v17 = vld [vmem:[%s1172_s1 + $0x20] sm:$0xff] (!%p189_p2)  ;;  %v886_v19 = vpack.c.bf16 (!%p189_p2), %v245_v16, %v243_v15  ;;  %v244_v20 = vld [vmem:[%s1172_s1 + $0x30] sm:$0xff] (!%p189_p2)  ;;  %v247_v21 = vld [vmem:[%s1172_s1 + $0x48] sm:$0xff] (!%p189_p2)  ;;  %v262_v48 = vsub.s32 (!%p189_p2), 1, %v257_v47 }
   0xa   : > { %903 = vmatprep.subr.bf16.mxu1 (!%p189_p2), %v902_v6  ;;  %v249_v22 = vld [vmem:[%s1172_s1 + $0x58] sm:$0xff] (!%p189_p2)  ;;  %v410_v23 = vld [vmem:[%s1174_s3 + $0x30] sm:$0xff] (!%p189_p2)  ;;  %883 = vmatprep.subr.bf16.mxu0 (!%p189_p2), %v882_v13  ;;  %v888_v26 = vpack.c.bf16 (!%p189_p2), %v244_v20, %v242_v17  ;;  %v246_v28 = vld [vmem:[%s1172_s1 + $0x40] sm:$0xff] (!%p189_p2)  ;;  %v258_v17 = vsub.s32 (!%p189_p2), 0, %v257_v47 }
   0xb   : > { %v411_v24 = vld [vmem:[%s1174_s3 + $0x38] sm:$0xff] (!%p189_p2)  ;;  %885 = vmatpush1.bf16.msra.mxu0 (!%p189_p2), %v884_v14  ;;  %v890_v27 = vpack.c.bf16 (!%p189_p2), %v249_v22, %v247_v21  ;;  %v248_v29 = vld [vmem:[%s1172_s1 + $0x50] sm:$0xff] (!%p189_p2)  ;;  %v251_v31 = vld [vmem:[%s1172_s1 + $0x68] sm:$0xff] (!%p189_p2) }
   0xc   : > { %v910_v30 = vpack.c.bf16 (!%p189_p2), %v411_v24, %v410_v23  ;;  %887 = vmatprep.subr.bf16.mxu0 (!%p189_p2), %v886_v19  ;;  %v253_v32 = vld [vmem:[%s1172_s1 + $0x78] sm:$0xff] (!%p189_p2)  ;;  %v892_v33 = vpack.c.bf16 (!%p189_p2), %v248_v29, %v246_v28  ;;  %v250_v35 = vld [vmem:[%s1172_s1 + $0x60] sm:$0xff] (!%p189_p2)  ;;  %v252_v36 = vld [vmem:[%s1172_s1 + $0x70] sm:$0xff] (!%p189_p2) }
   0xd   : > { %s1178_s26 = smov (!%p218_p3, %s783_s26), 23  ;;  %905 = vmatpush3.bf16.msra.mxu1 %v902_v6  ;;  %v894_v34 = vpack.c.bf16 %v253_v32, %v251_v31  ;;  %v517_v37 = vld [vmem:[%s1175_s4] sm:$0xff]  ;;  %v896_v38 = vpack.c.bf16 %v252_v36, %v250_v35 }
   0xe   : > { %s784_s23 = sshll.u32 %s1178_s26, 3  ;;  %907 = vmatprep.subr.bf16.mxu1 %v906_v18  ;;  %v254_v49 = vld [vmem:[%s1173_s2] sm:$0x3]  ;;  %s814_s6 = sshll.u32 %s1178_s26, 4 }
   0xf   : > { %s1033_s12 = scalar_lea.vmem %s1171_s0, %s784_s23  ;;  %889 = vmatpush1.bf16.msra.mxu0 %v888_v26  ;;  %v263_v50 = vrot.slane %v254_v49, %v262_v48  ;;  %s1116_s9 = scalar_lea.vmem %s1176_s5, %s814_s6 }
  0x10   : > { %v230_v25 = vld [vmem:[%s1033_s12] sm:$0xff]  ;;  %891 = vmatprep.subr.bf16.mxu0 %v890_v27  ;;  %v231_v39 = vld [vmem:[%s1033_s12 + $0x8] sm:$0xff]  ;;  %v232_v40 = vld [vmem:[%s1033_s12 + $0x10] sm:$0xff] }
  0x11   : > { %856 = vmatprep.mubr.msk.f32.mxu1 %vm266_vm0, %v230_v25  ;;  %909 = vmatpush3.bf16.msra.mxu1 %v906_v18  ;;  %v233_v41 = vld [vmem:[%s1033_s12 + $0x18] sm:$0xff]  ;;  %v234_v42 = vld [vmem:[%s1033_s12 + $0x20] sm:$0xff]  ;;  %v235_v43 = vld [vmem:[%s1033_s12 + $0x28] sm:$0xff]  ;;  %v259_v18 = vrot.slane %v254_v49, %v258_v17 }
  0x12   : > { %911 = vmatprep.subr.bf16.mxu1 %v910_v30  ;;  %v236_v44 = vld [vmem:[%s1033_s12 + $0x30] sm:$0xff]  ;;  %v237_v45 = vld [vmem:[%s1033_s12 + $0x38] sm:$0xff] }
  0x13   : > { %893 = vmatpush1.bf16.msra.mxu0 %v892_v33 }
  0x14   : > { %895 = vmatprep.subr.bf16.mxu0 %v894_v34 }
  0x15   : > { %913 = vmatpush3.bf16.msra.mxu1 %v910_v30 }
  0x16   : > { %868 = vmatprep.subr.mxu1 %v517_v37 }
  0x17   : > { %897 = vmatpush1.bf16.msra.mxu0 %v896_v38 }
  0x18   : > { %857 = vmatmul.mubr.msk.f32.vlgmr.msra.gmra.mrb[0].mxu1 %vm266_vm0, %v231_v39 }
  0x19   : > { %859 = vmatprep.mubr.msk.f32.mxu1 %vm266_vm0, %v232_v40  ;;  %869 = vmatpush3.msra.mxu1 %v517_v37 }
  0x1a   : > { %788 = vmatmul.mubr.msk.f32.vlgmr.msra.gmra.mrb[0].mxu0 %vm266_vm0, %v230_v25 }
  0x1b   : > { %361 = vmatprep.mubr.f32.mxu0 %v932_v5 }
  0x1c   : > { %860 = vmatmul.mubr.msk.f32.gmra.mrb[2].mxu1 %vm266_vm0, %v233_v41 }
  0x1d   : > { %862 = vmatprep.mubr.msk.f32.mxu1 %vm266_vm0, %v234_v42 }
  0x1e   : > { %789 = vmatmul.mubr.msk.f32.gmra.mrb[2].mxu0 %vm266_vm0, %v231_v39 }
  0x1f   : > { %367 = vmatprep.mubr.f32.mxu0 %v932_v5 }
  0x20   : > { %863 = vmatmul.mubr.msk.f32.gmra.mrb[4].mxu1 %vm266_vm0, %v235_v43 }
  0x21   : > { %865 = vmatprep.mubr.msk.f32.mxu1 %vm266_vm0, %v236_v44 }
  0x22   : > { %790 = vmatmul.mubr.msk.f32.gmra.mrb[4].mxu0 %vm266_vm0, %v232_v40 }
  0x23   : > { %373 = vmatprep.mubr.f32.mxu0 %v932_v5 }
  0x24   : > { %866 = vmatmul.mubr.msk.f32.gmra.mrb[6].mxu1 %vm266_vm0, %v237_v45 }
  0x26   : > { %791 = vmatmul.mubr.msk.f32.gmra.mrb[6].mxu0 %vm266_vm0, %v233_v41 }
  0x27   : > { %379 = vmatprep.mubr.f32.mxu0 %v932_v5 }
  0x2a   : > { %792 = vmatmul.mubr.msk.f32.gmra.mrb[8].mxu0 %vm266_vm0, %v234_v42 }
  0x2b   : > { %385 = vmatprep.mubr.f32.mxu0 %v932_v5 }
  0x2e   : > { %793 = vmatmul.mubr.msk.f32.gmra.mrb[10].mxu0 %vm266_vm0, %v235_v43 }
  0x2f   : > { %391 = vmatprep.mubr.f32.mxu0 %v932_v5 }
  0x32   : > { %794 = vmatmul.mubr.msk.f32.gmra.mrb[12].mxu0 %vm266_vm0, %v236_v44 }
  0x33   : > { %397 = vmatprep.mubr.f32.mxu0 %v932_v5 }
  0x36   : > { %795 = vmatmul.mubr.msk.f32.gmra.mrb[14].mxu0 %vm266_vm0, %v237_v45 }
  0xeb   : > { %v858_v51 = vpop.f32.mrb[0].mxu1 }
  0xec   : > { %v478_v52 = vpop.f32.mrb[1].mxu1 }
  0xed   : > { %870 = vmatprep.mubr.msk.f32.mxu1 %vm518_vm1, %v478_v52  ;;  %v357_v53 = vpop.f32.mrb[0].mxu0 }
  0xee   : > { %871 = vmatmul.mubr.msk.f32.vlgmr.msra.gmra.mrb[8].mxu1 %vm518_vm1, %v858_v51  ;;  %v359_v55 = vpop.f32.mrb[1].mxu0  ;;  %v358_v20 = vadd.f32 %v357_v53, %v259_v18 }
  0xef   : > { %v861_v54 = vpop.f32.mrb[2].mxu1  ;;  %v1092_v57 = vadd.f32 %v359_v55, %v263_v50 }
  0xf0   : > { %v488_v56 = vpop.f32.mrb[3].mxu1 }
  0xf1   : > { %873 = vmatprep.mubr.msk.f32.mxu1 %vm518_vm1, %v488_v56  ;;  %v363_v58 = vpop.f32.mrb[2].mxu0 }
  0xf2   : > { %874 = vmatmul.mubr.msk.f32.gmra.mrb[10].mxu1 %vm518_vm1, %v861_v54  ;;  %v365_v60 = vpop.f32.mrb[3].mxu0  ;;  %v364_v19 = vadd.f32 %v363_v58, %v259_v18 }
  0xf3   : > { %v864_v59 = vpop.f32.mrb[4].mxu1  ;;  %v1096_v62 = vadd.f32 %v365_v60, %v263_v50 }
  0xf4   : > { %v498_v61 = vpop.f32.mrb[5].mxu1 }
  0xf5   : > { %876 = vmatprep.mubr.msk.f32.mxu1 %vm518_vm1, %v498_v61  ;;  %v369_v63 = vpop.f32.mrb[4].mxu0 }
  0xf6   : > { %877 = vmatmul.mubr.msk.f32.gmra.mrb[12].mxu1 %vm518_vm1, %v864_v59  ;;  %v371_v2 = vpop.f32.mrb[5].mxu0  ;;  %v370_v27 = vadd.f32 %v369_v63, %v259_v18 }
  0xf7   : > { %v867_v0 = vpop.f32.mrb[6].mxu1  ;;  %v1102_v4 = vadd.f32 %v371_v2, %v263_v50 }
  0xf8   : > { %v508_v1 = vpop.f32.mrb[7].mxu1 }
  0xf9   : > { %879 = vmatprep.mubr.msk.f32.mxu1 %vm518_vm1, %v508_v1  ;;  %v375_v3 = vpop.f32.mrb[6].mxu0 }
  0xfa   : > { %880 = vmatmul.mubr.msk.f32.gmra.mrb[14].mxu1 %vm518_vm1, %v867_v0  ;;  %v377_v5 = vpop.f32.mrb[7].mxu0  ;;  %v376_v25 = vadd.f32 %v375_v3, %v259_v18 }
  0xfb   : > { %v1104_v6 = vadd.f32 %v377_v5, %v263_v50 }
  0xfd   : > { %v381_v7 = vpop.f32.mrb[8].mxu0 }
  0xfe   : > { %v383_v8 = vpop.f32.mrb[9].mxu0  ;;  %v382_v35 = vadd.f32 %v381_v7, %v259_v18 }
  0xff   : > { %v1106_v11 = vadd.f32 %v383_v8, %v263_v50 }
 0x101   : > { %v387_v9 = vpop.f32.mrb[10].mxu0 }
 0x102   : > { %v389_v10 = vpop.f32.mrb[11].mxu0  ;;  %v388_v34 = vadd.f32 %v387_v9, %v259_v18 }
 0x103   : > { %v1108_v12 = vadd.f32 %v389_v10, %v263_v50 }
 0x105   : > { %v393_v13 = vpop.f32.mrb[12].mxu0 }
 0x106   : > { %v395_v14 = vpop.f32.mrb[13].mxu0  ;;  %v394_v43 = vadd.f32 %v393_v13, %v259_v18 }
 0x107   : > { %v1110_v16 = vadd.f32 %v395_v14, %v263_v50 }
 0x109   : > { %v399_v15 = vpop.f32.mrb[14].mxu0 }
 0x10a   : > { %v401_v22 = vpop.f32.mrb[15].mxu0  ;;  %v400_v42 = vadd.f32 %v399_v15, %v259_v18 }
 0x10b   : > { %v1119_v26 = vadd.f32 %v401_v22, %v263_v50 }
 0x1c1   : > { %v872_v21 = vpop.f32.mrb[8].mxu1 }
 0x1c2   : > { %v649_v23 = vadd.f32 %v872_v21, %v364_v19  ;;  %666 = vrot.lane.b32.xlu0 %v872_v21, %s933_s10  ;;  %v609_v24 = vpop.f32.mrb[9].mxu1 }
 0x1c3   : > { %v648_v28 = vadd.f32 %v609_v24, %v358_v20 }
 0x1c4   : > { %v697_v29 = vsel %vm266_vm0, %v649_v23, %v364_v19 }
 0x1c5   : > { %706 = vst [vmem:[%s1116_s9 + $0x10] sm:$0xff] %v697_v29  ;;  %v696_v30 = vsel %vm266_vm0, %v648_v28, %v358_v20  ;;  %v875_v31 = vpop.f32.mrb[10].mxu1 }
 0x1c6   : > { %704 = vst [vmem:[%s1116_s9] sm:$0xff] %v696_v30  ;;  %v651_v32 = vadd.f32 %v875_v31, %v376_v25  ;;  %664 = vrot.lane.b32.xlu0 %v609_v24, %s933_s10  ;;  %670 = vrot.lane.b32.xlu1 %v875_v31, %s933_s10  ;;  %v619_v33 = vpop.f32.mrb[11].mxu1 }
 0x1c7   : > { %v650_v36 = vadd.f32 %v619_v33, %v370_v27 }
 0x1c8   : > { %v699_v37 = vsel %vm266_vm0, %v651_v32, %v376_v25 }
 0x1c9   : > { %710 = vst [vmem:[%s1116_s9 + $0x30] sm:$0xff] %v699_v37  ;;  %v698_v38 = vsel %vm266_vm0, %v650_v36, %v370_v27  ;;  %v878_v39 = vpop.f32.mrb[12].mxu1 }
 0x1ca   : > { %708 = vst [vmem:[%s1116_s9 + $0x20] sm:$0xff] %v698_v38  ;;  %v653_v40 = vadd.f32 %v878_v39, %v388_v34  ;;  %668 = vrot.lane.b32.xlu1 %v619_v33, %s933_s10  ;;  %v629_v41 = vpop.f32.mrb[13].mxu1 }
 0x1cb   : > { %v652_v44 = vadd.f32 %v629_v41, %v382_v35  ;;  %672 = vrot.lane.b32.xlu0 %v629_v41, %s933_s10 }
 0x1cc   : > { %v701_v45 = vsel %vm266_vm0, %v653_v40, %v388_v34 }
 0x1cd   : > { %714 = vst [vmem:[%s1116_s9 + $0x50] sm:$0xff] %v701_v45  ;;  %v700_v46 = vsel %vm266_vm0, %v652_v44, %v382_v35  ;;  %v881_v47 = vpop.f32.mrb[14].mxu1 }
 0x1ce   : > { %712 = vst [vmem:[%s1116_s9 + $0x40] sm:$0xff] %v700_v46  ;;  %v655_v48 = vadd.f32 %v881_v47, %v400_v42  ;;  %674 = vrot.lane.b32.xlu1 %v878_v39, %s933_s10  ;;  %v639_v49 = vpop.f32.mrb[15].mxu1 }
 0x1cf   : > { %v654_v50 = vadd.f32 %v639_v49, %v394_v43  ;;  %676 = vrot.lane.b32.xlu0 %v639_v49, %s933_s10 }
 0x1d0   : > { %v703_v51 = vsel %vm266_vm0, %v655_v48, %v400_v42 }
 0x1d1   : > { %718 = vst [vmem:[%s1116_s9 + $0x70] sm:$0xff] %v703_v51  ;;  %v702_v52 = vsel %vm266_vm0, %v654_v50, %v394_v43 }
 0x1d2   : > { %716 = vst [vmem:[%s1116_s9 + $0x60] sm:$0xff] %v702_v52  ;;  %678 = vrot.lane.b32.xlu1 %v881_v47, %s933_s10 }
 0x234   : > { %v667_v53 = vpop.permute.xlu0 %666 }
 0x235   : > { %v689_v54 = vadd.f32 %v667_v53, %v1096_v62 }
 0x237   : > { %707 = vst.msk [vmem:[%s1116_s9 + $0x18] sm:$0xff] %vm266_vm0, %v689_v54 }
 0x238   : > { %v665_v55 = vpop.permute.xlu0 %664  ;;  %v671_v56 = vpop.permute.xlu1 %670 }
 0x239   : > { %v688_v58 = vadd.f32 %v665_v55, %v1092_v57  ;;  %v691_v59 = vadd.f32 %v671_v56, %v1104_v6 }
 0x23b   : > { %705 = vst.msk [vmem:[%s1116_s9 + $0x8] sm:$0xff] %vm266_vm0, %v688_v58  ;;  %711 = vst.msk [vmem:[%s1116_s9 + $0x38] sm:$0xff] %vm266_vm0, %v691_v59 }
 0x23c   : > { %v669_v60 = vpop.permute.xlu1 %668 }
 0x23d   : > { %v690_v61 = vadd.f32 %v669_v60, %v1102_v4  ;;  %v673_v63 = vpop.permute.xlu0 %672 }
 0x23e   : > { %v692_v62 = vadd.f32 %v673_v63, %v1106_v11 }
 0x23f   : > { %709 = vst.msk [vmem:[%s1116_s9 + $0x28] sm:$0xff] %vm266_vm0, %v690_v61 }
 0x240   : > { %713 = vst.msk [vmem:[%s1116_s9 + $0x48] sm:$0xff] %vm266_vm0, %v692_v62  ;;  %v675_v0 = vpop.permute.xlu1 %674 }
 0x241   : > { %v693_v57 = vadd.f32 %v675_v0, %v1108_v12  ;;  %v677_v1 = vpop.permute.xlu0 %676 }
 0x242   : > { %v694_v2 = vadd.f32 %v677_v1, %v1110_v16 }
 0x243   : > { %715 = vst.msk [vmem:[%s1116_s9 + $0x58] sm:$0xff] %vm266_vm0, %v693_v57 }
 0x244   : > { %717 = vst.msk [vmem:[%s1116_s9 + $0x68] sm:$0xff] %vm266_vm0, %v694_v2  ;;  %v679_v3 = vpop.permute.xlu1 %678 }
 0x245   : > { %v695_v4 = vadd.f32 %v679_v3, %v1119_v26 }
 0x247   : > { %719 = vst.msk [vmem:[%s1116_s9 + $0x78] sm:$0xff] %vm266_vm0, %v695_v4 }
 0x248 PF: > { %s15_s18 = sadd.s32 1, %s930_s18  }
 0x249   : > { %p12_p4 = scmp.ge.s32.totalorder %s15_s18, 5  }
 0x24b   :  { %14 = sbr.rel (!%p12_p4) target bundleno = 1 (0x1), region = 70 }

</bundles_post_ra>
